<compile_context>
chip_gen: v7x
topology: tpu7x:2x2x1
jax: 0.10.0
libtpu: 0.0.40
codegen_flags: <defaults>
</compile_context>

<pallas_src>
import functools

import jax
import jax.numpy as jnp
from jax.experimental import pallas as pl
from jax.experimental.pallas import tpu as pltpu


# ---------------------------------------------------------------------------------
# Kernels
# ---------------------------------------------------------------------------------

def _score_kernel(z_ref, w1_ref, b1_ref, w2_ref, ssum_ref, *,
                  num_m, d, tm, true_n, needs_mask):
    """ssum[0, m] += sum_{rows in tile} w2 . tanh(z[row, m] @ W1 + b1)."""
    @pl.when(pl.program_id(0) == 0)
    def _():
        ssum_ref[...] = jnp.zeros_like(ssum_ref)

    w1 = w1_ref[...]                       # (D, H) bf16 (cast hoisted to the wrapper)
    b1 = b1_ref[...]                       # (1, H) f32
    w2 = w2_ref[...]                       # (1, H) f32

    if needs_mask:
        row0 = pl.program_id(0) * tm
        rows = row0 + jax.lax.broadcasted_iota(jnp.int32, (tm, 1), 0)
        valid = rows < true_n              # (tm, 1): padded rows contribute nothing

    lane = jax.lax.broadcasted_iota(jnp.int32, (1, num_m), 1)
    upd = jnp.zeros((1, num_m), jnp.float32)
    for mm in range(num_m):                # static unroll: M is small
        z_m = z_ref[:, mm * d:(mm + 1) * d].astype(jnp.bfloat16)     # free lane slice
        h_m = jnp.dot(z_m, w1, preferred_element_type=jnp.float32)   # (tm, H) f32 acc
        h_m = jnp.tanh(h_m + b1)
        s_m = jnp.sum(h_m * w2, axis=-1, keepdims=True)              # (tm, 1) f32
        if needs_mask:
            s_m = jnp.where(valid, s_m, 0.0)
        col = jnp.sum(s_m, axis=0, keepdims=True)                    # (1, 1)
        upd = upd + jnp.where(lane == mm, col, 0.0)                  # place in lane mm
    ssum_ref[...] += upd                   # single accumulator update per grid step


def _combine_kernel(ssum_ref, z_ref, o_ref, *, num_m, d, inv_n):
    """out[n, :] = sum_m softmax(ssum / N)[m] * z[n, m, :] for one node-row tile."""
    w = ssum_ref[...] * inv_n                            # mean over nodes, (1, M)
    w = w - jnp.max(w, axis=-1, keepdims=True)
    e = jnp.exp(w)
    beta = e / jnp.sum(e, axis=-1, keepdims=True)        # (1, M) softmax over metapaths

    acc = z_ref[:, 0:d] * beta[:, 0:1]                   # (tm, D) * (1, 1)
    for mm in range(1, num_m):                           # static unroll over metapaths
        acc = acc + z_ref[:, mm * d:(mm + 1) * d] * beta[:, mm:mm + 1]
    o_ref[...] = acc.astype(o_ref.dtype)


def _fused_kernel(z_ref, w1_ref, b1_ref, w2_ref, o_ref, *, num_m, d, inv_n):
    """Small-z path: z is read from HBM once; scores, softmax and combine fused."""
    w1 = w1_ref[...]
    b1 = b1_ref[...]
    w2 = w2_ref[...]

    lane = jax.lax.broadcasted_iota(jnp.int32, (1, num_m), 1)
    ssum = jnp.zeros((1, num_m), jnp.float32)
    for mm in range(num_m):
        z_m = z_ref[:, mm * d:(mm + 1) * d].astype(jnp.bfloat16)
        h_m = jnp.tanh(jnp.dot(z_m, w1, preferred_element_type=jnp.float32) + b1)
        col = jnp.sum(jnp.sum(h_m * w2, axis=-1, keepdims=True), axis=0, keepdims=True)
        ssum = ssum + jnp.where(lane == mm, col, 0.0)

    w = ssum * inv_n
    w = w - jnp.max(w, axis=-1, keepdims=True)
    e = jnp.exp(w)
    beta = e / jnp.sum(e, axis=-1, keepdims=True)

    acc = z_ref[:, 0:d] * beta[:, 0:1]
    for mm in range(1, num_m):
        acc = acc + z_ref[:, mm * d:(mm + 1) * d] * beta[:, mm:mm + 1]
    o_ref[...] = acc.astype(o_ref.dtype)


# ---------------------------------------------------------------------------------
# Wrapper
# ---------------------------------------------------------------------------------

def _row_tile(n, num_m, d, target_bytes=4 * 1024 * 1024):
    """Row tile: ~target_bytes of z per tile, multiple of 8, capped at padded N."""
    n_pad = -(-n // 8) * 8
    rows = max(8, (target_bytes // (num_m * d * 4)) // 8 * 8)
    return int(min(rows, n_pad))


def semantic_attention_forward(z, w1, b1, w2, *, row_tile=None, fuse=None):
    n, num_m, d = z.shape
    hdim = w1.shape[1]

    z2 = z.reshape(n, num_m * d)           # free row-major reshape: lane-dense layout
    w1_bf = w1.astype(jnp.bfloat16)        # hoist MXU-operand cast out of the kernels

    z_bytes = z.size * 4
    w_bytes = d * hdim * 2 + 2 * hdim * 4 + num_m * 4
    score_flops = 2 * n * num_m * d * hdim + 4 * n * num_m * hdim
    combine_flops = 2 * n * num_m * d

    if fuse is None:
        fuse = z_bytes <= 8 * 1024 * 1024  # z (and its intermediates) comfortably in VMEM

    if fuse:
        vmem_f = int(min(3 * z_bytes + 16 * 1024 * 1024, 40 * 1024 * 1024))
        return pl.pallas_call(
            functools.partial(_fused_kernel, num_m=num_m, d=d, inv_n=1.0 / n),
            out_shape=jax.ShapeDtypeStruct((n, d), z.dtype),
            grid=(1,),
            in_specs=[
                pl.BlockSpec((n, num_m * d), lambda i: (0, 0)),
                pl.BlockSpec((d, hdim), lambda i: (0, 0)),
                pl.BlockSpec((1, hdim), lambda i: (0, 0)),
                pl.BlockSpec((1, hdim), lambda i: (0, 0)),
            ],
            out_specs=pl.BlockSpec((n, d), lambda i: (0, 0)),
            compiler_params=pltpu.CompilerParams(
                dimension_semantics=("arbitrary",),
                vmem_limit_bytes=vmem_f,
            ),
            cost_estimate=pl.CostEstimate(
                flops=score_flops + combine_flops,
                transcendentals=n * num_m * hdim + num_m,
                bytes_accessed=z_bytes + n * d * 4 + w_bytes),
        )(z2, w1_bf, b1, w2)

    # ------------------------- two-pass path (large N) ----------------------------
    tm = row_tile if row_tile is not None else _row_tile(n, num_m, d)
    tm = int(max(8, -(-tm // 8) * 8))      # multiple of 8
    nt = int(pl.cdiv(n, tm))
    needs_mask = (n % tm) != 0

    z_tile_bytes = tm * num_m * d * 4
    out_tile_bytes = tm * d * 4
    vmem1 = int(min(2 * z_tile_bytes + w_bytes + 8 * 1024 * 1024, 40 * 1024 * 1024))
    vmem2 = int(min(2 * z_tile_bytes + 2 * out_tile_bytes + 6 * 1024 * 1024,
                    40 * 1024 * 1024))

    # Kernel 1: per-metapath score sums (reduction over node tiles, resident (1, M) out).
    ssum = pl.pallas_call(
        functools.partial(_score_kernel, num_m=num_m, d=d, tm=tm,
                          true_n=n, needs_mask=needs_mask),
        out_shape=jax.ShapeDtypeStruct((1, num_m), jnp.float32),
        grid=(nt,),
        in_specs=[
            pl.BlockSpec((tm, num_m * d), lambda i: (i, 0)),
            pl.BlockSpec((d, hdim), lambda i: (0, 0)),
            pl.BlockSpec((1, hdim), lambda i: (0, 0)),
            pl.BlockSpec((1, hdim), lambda i: (0, 0)),
        ],
        out_specs=pl.BlockSpec((1, num_m), lambda i: (0, 0)),
        compiler_params=pltpu.CompilerParams(
            dimension_semantics=("arbitrary",),          # accumulator output
            vmem_limit_bytes=vmem1,
        ),
        cost_estimate=pl.CostEstimate(
            flops=score_flops, transcendentals=n * num_m * hdim,
            bytes_accessed=z_bytes + w_bytes + num_m * 4),
    )(z2, w1_bf, b1, w2)

    # Kernel 2: softmax over metapaths + weighted combine (independent node tiles).
    out = pl.pallas_call(
        functools.partial(_combine_kernel, num_m=num_m, d=d, inv_n=1.0 / n),
        out_shape=jax.ShapeDtypeStruct((n, d), z.dtype),
        grid=(nt,),
        in_specs=[
            pl.BlockSpec((1, num_m), lambda i: (0, 0)),
            pl.BlockSpec((tm, num_m * d), lambda i: (i, 0)),
        ],
        out_specs=pl.BlockSpec((tm, d), lambda i: (i, 0)),
        compiler_params=pltpu.CompilerParams(
            dimension_semantics=("parallel",),
            vmem_limit_bytes=vmem2,
        ),
        cost_estimate=pl.CostEstimate(
            flops=combine_flops, transcendentals=num_m,
            bytes_accessed=z_bytes + n * d * 4 + num_m * 4),
    )(ssum, z2)
    return out


def reference_forward(z, w1, b1, w2):
    h = jnp.tanh(jnp.einsum('nmd,dh->nmh', z, w1) + b1)     # (N, M, H)
    s = jnp.einsum('nmh,h->nm', h, w2[0])                   # (N, M)
    w_mean = jnp.mean(s, axis=0)                            # (M,)
    beta = jax.nn.softmax(w_mean, axis=0)                   # (M,)
    return jnp.einsum('m,nmd->nd', beta, z)                 # (N, D)


if __name__ == "__main__":
    key = jax.random.PRNGKey(0)
    k_z, k_w1, k_b1, k_w2, k_z2 = jax.random.split(key, 5)

    in_size, hidden_size, num_meta = 128, 128, 4

    lim1 = (6.0 / (in_size + hidden_size)) ** 0.5
    w1 = jax.random.uniform(k_w1, (in_size, hidden_size), minval=-lim1, maxval=lim1,
                            dtype=jnp.float32)
    b1 = jax.random.uniform(k_b1, (1, hidden_size), minval=-0.1, maxval=0.1,
                            dtype=jnp.float32)
    lim2 = (6.0 / (hidden_size + 1)) ** 0.5
    w2 = jax.random.uniform(k_w2, (1, hidden_size), minval=-lim2, maxval=lim2,
                            dtype=jnp.float32)

    # Case 1: small N -> fused single kernel (z read from HBM exactly once).
    z_a = jax.random.normal(k_z, (64, num_meta, in_size), dtype=jnp.float32)
    out_a = semantic_attention_forward(z_a, w1, b1, w2)
    jax.block_until_ready(out_a)
    ref_a = reference_forward(z_a, w1, b1, w2)
    assert out_a.shape == (64, in_size)
    # bf16 MXU operands (f32 accumulation) introduce small rounding vs the f32 reference.
    assert jnp.allclose(out_a, ref_a, atol=2e-2, rtol=2e-2), "fused path mismatch"

    # Case 2: N not a multiple of the row tile -> two-pass path with cdiv grid + masking.
    z_b = jax.random.normal(k_z2, (200, num_meta, in_size), dtype=jnp.float32)
    out_b = semantic_attention_forward(z_b, w1, b1, w2, row_tile=64, fuse=False)
    jax.block_until_ready(out_b)
    ref_b = reference_forward(z_b, w1, b1, w2)
    assert out_b.shape == (200, in_size)
    assert jnp.allclose(out_b, ref_b, atol=2e-2, rtol=2e-2), "two-pass path mismatch"

    print("KERNEL_OK")
</pallas_src>

<mosaic_0001>
module attributes {stable_mosaic.version = 11 : i64} {
  func.func @_fused_kernel(%arg0: i32, %arg1: memref<64x512xf32, #tpu.memory_space<vmem>>, %arg2: memref<128x128xbf16, #tpu.memory_space<vmem>>, %arg3: memref<1x128xf32, #tpu.memory_space<vmem>>, %arg4: memref<1x128xf32, #tpu.memory_space<vmem>>, %arg5: memref<64x128xf32, #tpu.memory_space<vmem>>) attributes {dimension_semantics = [#tpu.dimension_semantics<arbitrary>], iteration_bounds = array<i64: 1>, scalar_prefetch = 0 : i64, scratch_operands = 0 : i64, tpu.core_type = #tpu.core_type<tc>, window_params = [{pipeline_mode = #tpu.pipeline_mode<synchronous>, transform_indices = @transform_0, window_bounds = array<i64: 64, 512>}, {pipeline_mode = #tpu.pipeline_mode<synchronous>, transform_indices = @transform_1, window_bounds = array<i64: 128, 128>}, {pipeline_mode = #tpu.pipeline_mode<synchronous>, transform_indices = @transform_2, window_bounds = array<i64: 1, 128>}, {pipeline_mode = #tpu.pipeline_mode<synchronous>, transform_indices = @transform_3, window_bounds = array<i64: 1, 128>}, {pipeline_mode = #tpu.pipeline_mode<synchronous>, transform_indices = @transform_4, window_bounds = array<i64: 64, 128>}]} {
    %c0 = arith.constant 0 : index
    %c0_0 = arith.constant 0 : index
    %0 = vector.load %arg2[%c0, %c0_0] : memref<128x128xbf16, #tpu.memory_space<vmem>>, vector<128x128xbf16>
    %c0_1 = arith.constant 0 : index
    %c0_2 = arith.constant 0 : index
    %1 = vector.load %arg3[%c0_1, %c0_2] : memref<1x128xf32, #tpu.memory_space<vmem>>, vector<1x128xf32>
    %c0_3 = arith.constant 0 : index
    %c0_4 = arith.constant 0 : index
    %2 = vector.load %arg4[%c0_3, %c0_4] : memref<1x128xf32, #tpu.memory_space<vmem>>, vector<1x128xf32>
    %3 = tpu.iota {dimensions = array<i32: 1>} : vector<1x4xi32>
    %cst = arith.constant 0.000000e+00 : f32
    %4 = vector.broadcast %cst : f32 to vector<1x4xf32>
    %c0_5 = arith.constant 0 : index
    %c0_6 = arith.constant 0 : index
    %5 = vector.load %arg1[%c0_5, %c0_6] : memref<64x512xf32, #tpu.memory_space<vmem>>, vector<64x128xf32>
    %6 = arith.truncf %5 : vector<64x128xf32> to vector<64x128xbf16>
    %cst_7 = arith.constant dense<0.000000e+00> : vector<64x128xf32>
    %7 = tpu.matmul %6, %0, %cst_7 {dimension_numbers = #tpu.dot_dimension_numbers<[1], [0], [0], [1], [0, 0, 1, 1], [], []>} : vector<64x128xbf16>, vector<128x128xbf16>, vector<64x128xf32> -> vector<64x128xf32>
    %8 = vector.broadcast %1 : vector<1x128xf32> to vector<64x128xf32>
    %9 = arith.addf %7, %8 : vector<64x128xf32>
    %10 = math.tanh %9 : vector<64x128xf32>
    %11 = vector.broadcast %2 : vector<1x128xf32> to vector<64x128xf32>
    %12 = arith.mulf %10, %11 : vector<64x128xf32>
    %cst_8 = arith.constant dense<0.000000e+00> : vector<64xf32>
    %13 = vector.multi_reduction <add>, %12, %cst_8 [1] : vector<64x128xf32> to vector<64xf32>
    %14 = vector.shape_cast %13 : vector<64xf32> to vector<64x1xf32>
    %cst_9 = arith.constant dense<0.000000e+00> : vector<1xf32>
    %15 = vector.multi_reduction <add>, %14, %cst_9 [0] : vector<64x1xf32> to vector<1xf32>
    %16 = vector.shape_cast %15 : vector<1xf32> to vector<1x1xf32>
    %c0_i32 = arith.constant 0 : i32
    %17 = vector.broadcast %c0_i32 : i32 to vector<1x4xi32>
    %18 = arith.cmpi eq, %3, %17 : vector<1x4xi32>
    %cst_10 = arith.constant 0.000000e+00 : f32
    %19 = vector.shape_cast %16 : vector<1x1xf32> to vector<1x1xf32>
    %20 = vector.broadcast %19 : vector<1x1xf32> to vector<1x4xf32>
    %21 = vector.broadcast %cst_10 : f32 to vector<1x4xf32>
    %22 = arith.select %18, %20, %21 : vector<1x4xi1>, vector<1x4xf32>
    %23 = arith.addf %4, %22 : vector<1x4xf32>
    %c0_11 = arith.constant 0 : index
    %c128 = arith.constant 128 : index
    %24 = vector.load %arg1[%c0_11, %c128] : memref<64x512xf32, #tpu.memory_space<vmem>>, vector<64x128xf32>
    %25 = arith.truncf %24 : vector<64x128xf32> to vector<64x128xbf16>
    %cst_12 = arith.constant dense<0.000000e+00> : vector<64x128xf32>
    %26 = tpu.matmul %25, %0, %cst_12 {dimension_numbers = #tpu.dot_dimension_numbers<[1], [0], [0], [1], [0, 0, 1, 1], [], []>} : vector<64x128xbf16>, vector<128x128xbf16>, vector<64x128xf32> -> vector<64x128xf32>
    %27 = vector.broadcast %1 : vector<1x128xf32> to vector<64x128xf32>
    %28 = arith.addf %26, %27 : vector<64x128xf32>
    %29 = math.tanh %28 : vector<64x128xf32>
    %30 = vector.broadcast %2 : vector<1x128xf32> to vector<64x128xf32>
    %31 = arith.mulf %29, %30 : vector<64x128xf32>
    %cst_13 = arith.constant dense<0.000000e+00> : vector<64xf32>
    %32 = vector.multi_reduction <add>, %31, %cst_13 [1] : vector<64x128xf32> to vector<64xf32>
    %33 = vector.shape_cast %32 : vector<64xf32> to vector<64x1xf32>
    %cst_14 = arith.constant dense<0.000000e+00> : vector<1xf32>
    %34 = vector.multi_reduction <add>, %33, %cst_14 [0] : vector<64x1xf32> to vector<1xf32>
    %35 = vector.shape_cast %34 : vector<1xf32> to vector<1x1xf32>
    %c1_i32 = arith.constant 1 : i32
    %36 = vector.broadcast %c1_i32 : i32 to vector<1x4xi32>
    %37 = arith.cmpi eq, %3, %36 : vector<1x4xi32>
    %cst_15 = arith.constant 0.000000e+00 : f32
    %38 = vector.shape_cast %35 : vector<1x1xf32> to vector<1x1xf32>
    %39 = vector.broadcast %38 : vector<1x1xf32> to vector<1x4xf32>
    %40 = vector.broadcast %cst_15 : f32 to vector<1x4xf32>
    %41 = arith.select %37, %39, %40 : vector<1x4xi1>, vector<1x4xf32>
    %42 = arith.addf %23, %41 : vector<1x4xf32>
    %c0_16 = arith.constant 0 : index
    %c256 = arith.constant 256 : index
    %43 = vector.load %arg1[%c0_16, %c256] : memref<64x512xf32, #tpu.memory_space<vmem>>, vector<64x128xf32>
    %44 = arith.truncf %43 : vector<64x128xf32> to vector<64x128xbf16>
    %cst_17 = arith.constant dense<0.000000e+00> : vector<64x128xf32>
    %45 = tpu.matmul %44, %0, %cst_17 {dimension_numbers = #tpu.dot_dimension_numbers<[1], [0], [0], [1], [0, 0, 1, 1], [], []>} : vector<64x128xbf16>, vector<128x128xbf16>, vector<64x128xf32> -> vector<64x128xf32>
    %46 = vector.broadcast %1 : vector<1x128xf32> to vector<64x128xf32>
    %47 = arith.addf %45, %46 : vector<64x128xf32>
    %48 = math.tanh %47 : vector<64x128xf32>
    %49 = vector.broadcast %2 : vector<1x128xf32> to vector<64x128xf32>
    %50 = arith.mulf %48, %49 : vector<64x128xf32>
    %cst_18 = arith.constant dense<0.000000e+00> : vector<64xf32>
    %51 = vector.multi_reduction <add>, %50, %cst_18 [1] : vector<64x128xf32> to vector<64xf32>
    %52 = vector.shape_cast %51 : vector<64xf32> to vector<64x1xf32>
    %cst_19 = arith.constant dense<0.000000e+00> : vector<1xf32>
    %53 = vector.multi_reduction <add>, %52, %cst_19 [0] : vector<64x1xf32> to vector<1xf32>
    %54 = vector.shape_cast %53 : vector<1xf32> to vector<1x1xf32>
    %c2_i32 = arith.constant 2 : i32
    %55 = vector.broadcast %c2_i32 : i32 to vector<1x4xi32>
    %56 = arith.cmpi eq, %3, %55 : vector<1x4xi32>
    %cst_20 = arith.constant 0.000000e+00 : f32
    %57 = vector.shape_cast %54 : vector<1x1xf32> to vector<1x1xf32>
    %58 = vector.broadcast %57 : vector<1x1xf32> to vector<1x4xf32>
    %59 = vector.broadcast %cst_20 : f32 to vector<1x4xf32>
    %60 = arith.select %56, %58, %59 : vector<1x4xi1>, vector<1x4xf32>
    %61 = arith.addf %42, %60 : vector<1x4xf32>
    %c0_21 = arith.constant 0 : index
    %c384 = arith.constant 384 : index
    %62 = vector.load %arg1[%c0_21, %c384] : memref<64x512xf32, #tpu.memory_space<vmem>>, vector<64x128xf32>
    %63 = arith.truncf %62 : vector<64x128xf32> to vector<64x128xbf16>
    %cst_22 = arith.constant dense<0.000000e+00> : vector<64x128xf32>
    %64 = tpu.matmul %63, %0, %cst_22 {dimension_numbers = #tpu.dot_dimension_numbers<[1], [0], [0], [1], [0, 0, 1, 1], [], []>} : vector<64x128xbf16>, vector<128x128xbf16>, vector<64x128xf32> -> vector<64x128xf32>
    %65 = vector.broadcast %1 : vector<1x128xf32> to vector<64x128xf32>
    %66 = arith.addf %64, %65 : vector<64x128xf32>
    %67 = math.tanh %66 : vector<64x128xf32>
    %68 = vector.broadcast %2 : vector<1x128xf32> to vector<64x128xf32>
    %69 = arith.mulf %67, %68 : vector<64x128xf32>
    %cst_23 = arith.constant dense<0.000000e+00> : vector<64xf32>
    %70 = vector.multi_reduction <add>, %69, %cst_23 [1] : vector<64x128xf32> to vector<64xf32>
    %71 = vector.shape_cast %70 : vector<64xf32> to vector<64x1xf32>
    %cst_24 = arith.constant dense<0.000000e+00> : vector<1xf32>
    %72 = vector.multi_reduction <add>, %71, %cst_24 [0] : vector<64x1xf32> to vector<1xf32>
    %73 = vector.shape_cast %72 : vector<1xf32> to vector<1x1xf32>
    %c3_i32 = arith.constant 3 : i32
    %74 = vector.broadcast %c3_i32 : i32 to vector<1x4xi32>
    %75 = arith.cmpi eq, %3, %74 : vector<1x4xi32>
    %cst_25 = arith.constant 0.000000e+00 : f32
    %76 = vector.shape_cast %73 : vector<1x1xf32> to vector<1x1xf32>
    %77 = vector.broadcast %76 : vector<1x1xf32> to vector<1x4xf32>
    %78 = vector.broadcast %cst_25 : f32 to vector<1x4xf32>
    %79 = arith.select %75, %77, %78 : vector<1x4xi1>, vector<1x4xf32>
    %80 = arith.addf %61, %79 : vector<1x4xf32>
    %cst_26 = arith.constant 1.562500e-02 : f32
    %81 = vector.broadcast %cst_26 : f32 to vector<1x4xf32>
    %82 = arith.mulf %80, %81 : vector<1x4xf32>
    %cst_27 = arith.constant dense<0xFF800000> : vector<1xf32>
    %83 = vector.multi_reduction <maximumf>, %82, %cst_27 [1] : vector<1x4xf32> to vector<1xf32>
    %84 = vector.shape_cast %83 : vector<1xf32> to vector<1x1xf32>
    %85 = vector.broadcast %84 : vector<1x1xf32> to vector<1x4xf32>
    %86 = arith.subf %82, %85 : vector<1x4xf32>
    %87 = math.exp %86 : vector<1x4xf32>
    %cst_28 = arith.constant dense<0.000000e+00> : vector<1xf32>
    %88 = vector.multi_reduction <add>, %87, %cst_28 [1] : vector<1x4xf32> to vector<1xf32>
    %89 = vector.shape_cast %88 : vector<1xf32> to vector<1x1xf32>
    %90 = vector.broadcast %89 : vector<1x1xf32> to vector<1x4xf32>
    %91 = arith.divf %87, %90 : vector<1x4xf32>
    %c0_29 = arith.constant 0 : index
    %c0_30 = arith.constant 0 : index
    %92 = vector.load %arg1[%c0_29, %c0_30] : memref<64x512xf32, #tpu.memory_space<vmem>>, vector<64x128xf32>
    %93 = vector.extract_strided_slice %91 {offsets = [0, 0], sizes = [1, 1], strides = [1, 1]} : vector<1x4xf32> to vector<1x1xf32>
    %94 = vector.broadcast %93 : vector<1x1xf32> to vector<64x128xf32>
    %95 = arith.mulf %92, %94 : vector<64x128xf32>
    %c0_31 = arith.constant 0 : index
    %c128_32 = arith.constant 128 : index
    %96 = vector.load %arg1[%c0_31, %c128_32] : memref<64x512xf32, #tpu.memory_space<vmem>>, vector<64x128xf32>
    %97 = vector.extract_strided_slice %91 {offsets = [0, 1], sizes = [1, 1], strides = [1, 1]} : vector<1x4xf32> to vector<1x1xf32>
    %98 = vector.broadcast %97 : vector<1x1xf32> to vector<64x128xf32>
    %99 = arith.mulf %96, %98 : vector<64x128xf32>
    %100 = arith.addf %95, %99 : vector<64x128xf32>
    %c0_33 = arith.constant 0 : index
    %c256_34 = arith.constant 256 : index
    %101 = vector.load %arg1[%c0_33, %c256_34] : memref<64x512xf32, #tpu.memory_space<vmem>>, vector<64x128xf32>
    %102 = vector.extract_strided_slice %91 {offsets = [0, 2], sizes = [1, 1], strides = [1, 1]} : vector<1x4xf32> to vector<1x1xf32>
    %103 = vector.broadcast %102 : vector<1x1xf32> to vector<64x128xf32>
    %104 = arith.mulf %101, %103 : vector<64x128xf32>
    %105 = arith.addf %100, %104 : vector<64x128xf32>
    %c0_35 = arith.constant 0 : index
    %c384_36 = arith.constant 384 : index
    %106 = vector.load %arg1[%c0_35, %c384_36] : memref<64x512xf32, #tpu.memory_space<vmem>>, vector<64x128xf32>
    %107 = vector.extract_strided_slice %91 {offsets = [0, 3], sizes = [1, 1], strides = [1, 1]} : vector<1x4xf32> to vector<1x1xf32>
    %108 = vector.broadcast %107 : vector<1x1xf32> to vector<64x128xf32>
    %109 = arith.mulf %106, %108 : vector<64x128xf32>
    %110 = arith.addf %105, %109 : vector<64x128xf32>
    %c0_37 = arith.constant 0 : index
    %c0_38 = arith.constant 0 : index
    %111 = vector.load %arg5[%c0_37, %c0_38] : memref<64x128xf32, #tpu.memory_space<vmem>>, vector<64x128xf32>
    tpu.vector_store %arg5[%c0_37, %c0_38], %110 {strides = array<i32>} : memref<64x128xf32, #tpu.memory_space<vmem>>, vector<64x128xf32>,
    return
  }
  func.func @transform_0(%arg0: i32) -> (i32, i32) {
    %c0_i32 = arith.constant 0 : i32
    %c0_i32_0 = arith.constant 0 : i32
    %c0_i32_1 = arith.constant 0 : i32
    return %c0_i32, %c0_i32_0 : i32, i32
  }
  func.func @transform_1(%arg0: i32) -> (i32, i32) {
    %c0_i32 = arith.constant 0 : i32
    %c0_i32_0 = arith.constant 0 : i32
    %c0_i32_1 = arith.constant 0 : i32
    return %c0_i32, %c0_i32_0 : i32, i32
  }
  func.func @transform_2(%arg0: i32) -> (i32, i32) {
    %c0_i32 = arith.constant 0 : i32
    %c0_i32_0 = arith.constant 0 : i32
    %c0_i32_1 = arith.constant 0 : i32
    return %c0_i32, %c0_i32_0 : i32, i32
  }
  func.func @transform_3(%arg0: i32) -> (i32, i32) {
    %c0_i32 = arith.constant 0 : i32
    %c0_i32_0 = arith.constant 0 : i32
    %c0_i32_1 = arith.constant 0 : i32
    return %c0_i32, %c0_i32_0 : i32, i32
  }
  func.func @transform_4(%arg0: i32) -> (i32, i32) {
    %c0_i32 = arith.constant 0 : i32
    %c0_i32_0 = arith.constant 0 : i32
    %c0_i32_1 = arith.constant 0 : i32
    return %c0_i32, %c0_i32_0 : i32, i32
  }
}

</mosaic_0001>

<bundles_post_ra>
// kernel: tpu_custom_call.1
= control target key start
LH: loop header
LB: loop body
LE: loop exit
PB: predicated region body
PF: predicated region fallthrough
CT: control target
= control target key end

     0   :  { %9 = vsyncpa [#allocation3], 0  ;;  %s1415_s0 = inlined_call_operand.hbm [shape: f32[64,512], index: 0, kind: input, shape index: {}]   ;;  %s1416_s1 = inlined_call_operand.hbm [shape: bf16[128,128], index: 1, kind: input, shape index: {}]   ;;  %s1417_s2 = inlined_call_operand.vmem [shape: f32[1,128], index: 2, kind: input, shape index: {}]   ;;  %s1418_s3 = inlined_call_operand.vmem [shape: f32[1,128], index: 3, kind: input, shape index: {}]   ;;  %s1419_s4 = inlined_call_operand.hbm [shape: f32[64,128], index: 4, kind: output, shape index: {}]  }
   0x1   :  { %10 = vsyncpa [#allocation6], 0 }
   0x2   :  { %11 = vsyncpa [#allocation4], 0  ;;  %s1059_s15 = smov [#allocation2]   ;;  %s987_s19 = scalar_lea.hbm %s1415_s0, 4096 }
   0x3   :  { %s17_s16 = sshll.u32 %s1059_s15, 4  ;;  %p988_p0 = scmp.ne.s32.totalorder %s1415_s0, %s987_s19  ;;  %s18_s16 = int_to_ptr.vmem [resolvable:$true] %s17_s16 }
   0x4   :  { %p991_p1 = scmp.lt.u32.totalorder %s987_s19, %s1415_s0 }
   0x6   :  { %p993_p2 = pnand %p991_p1, %p988_p0 }
   0x8   :  { %996 = shalt.err (!%p993_p2)
}
   0x9   :  { %s997_s24 = scalar_lea.vmem %s18_s16, 4096  ;;  %p1002_p4 = scmp.lt.s32.totalorder %s18_s16, %s18_s16 }
   0xa   :  { %p998_p3 = scmp.ne.s32.totalorder %s18_s16, %s997_s24  ;;  %p1003_p5 = scmp.lt.s32.totalorder %s997_s24, %s997_s24 }
   0xc   :  { %p1004_p6 = por %p1003_p5, %p1002_p4 }
   0xe   :  { %p1005_p7 = pnand %p1004_p6, %p998_p3 }
  0x10   :  { %1008 = shalt.err (!%p1005_p7)
}
  0x11   :  { %s1060_s25 = smov 512   ;;  %s1061_s26 = smov 32  }
  0x12   :  { %23 = dma.hbm_to_vmem [thread:$0]  %s1415_s0, 4096, %s18_s16, [#allocation3], %s1060_s25, %s1060_s25, %s1061_s26  }
  0x13   :  { %s1062_s29 = smov [#allocation5]   ;;  %s1009_s7 = scalar_lea.hbm %s1416_s1, 1024 }
  0x14   :  { %s29_s30 = sshll.u32 %s1062_s29, 4  ;;  %p1010_p8 = scmp.ne.s32.totalorder %s1416_s1, %s1009_s7  ;;  %s30_s30 = int_to_ptr.vmem [resolvable:$true] %s29_s30 }
  0x15   :  { %p1013_p9 = scmp.lt.u32.totalorder %s1009_s7, %s1416_s1 }
  0x17   :  { %p1015_p10 = pnand %p1013_p9, %p1010_p8 }
  0x19   :  { %1018 = shalt.err (!%p1015_p10)
}
  0x1a   :  { %s1019_s12 = scalar_lea.vmem %s30_s30, 1024  ;;  %p1024_p12 = scmp.lt.s32.totalorder %s30_s30, %s30_s30 }
  0x1b   :  { %p1020_p11 = scmp.ne.s32.totalorder %s30_s30, %s1019_s12  ;;  %p1025_p13 = scmp.lt.s32.totalorder %s1019_s12, %s1019_s12 }
  0x1d   :  { %p1026_p0 = por %p1025_p13, %p1024_p12 }
  0x1f   :  { %p1027_p1 = pnand %p1026_p0, %p1020_p11 }
  0x21   :  { %1030 = shalt.err (!%p1027_p1)
}
  0x22   :  { %s1063_s0 = smov 64   ;;  %s1064_s13 = smov 4  }
  0x23   :  { %35 = dma.hbm_to_vmem [thread:$0]  %s1416_s1, 1024, %s30_s30, [#allocation6], %s1063_s0, %s1063_s0, %s1064_s13  }
  0x24   :  { %1053 = dma.done.wait [#allocation3], 4096  }
  0x25   :  { %1054 = vsyncadd [#allocation3], 4294963200 }
  0x26   :  { %1055 = dma.done.wait [#allocation6], 1024  }
  0x27   :  { %1056 = vsyncadd [#allocation6], 4294966272  ;;  %v1121_v0 = vld [vmem:[#allocation5] sm:$0xff]   ;;  %v1123_v1 = vld [vmem:[#allocation5 + $0x8] sm:$0xff]   ;;  %vm628_vm4 = vcmask 31744  }
  0x28   :  { %797 = vmatprep.subr.bf16.mxu0 %v1121_v0  ;;  %821 = vmatprep.subr.bf16.mxu1 %v1121_v0  ;;  %v1131_v2 = vld [vmem:[#allocation5 + $0x10] sm:$0xff]   ;;  %v1135_v3 = vld [vmem:[#allocation5 + $0x18] sm:$0xff]   ;;  %v1139_v4 = vld [vmem:[#allocation2] sm:$0xff] }
  0x29   :  { %798 = vmatpush3.bf16.msra.mxu0 %v1121_v0  ;;  %822 = vmatpush3.bf16.msra.mxu1 %v1121_v0  ;;  %v1141_v5 = vld [vmem:[#allocation2 + $0x20] sm:$0xff]  ;;  %v1143_v6 = vld [vmem:[#allocation2 + $0x8] sm:$0xff]  ;;  %v1167_v12 = vld [vmem:[#allocation5 + $0x30] sm:$0xff]  }
  0x2a   :  { %799 = vmatprep.subr.bf16.mxu0 %v1123_v1  ;;  %823 = vmatprep.subr.bf16.mxu1 %v1123_v1  ;;  %v75_v7 = vpack.c.bf16 %v1141_v5, %v1139_v4  ;;  %v1147_v8 = vld [vmem:[#allocation2 + $0x28] sm:$0xff]  ;;  %v1155_v10 = vld [vmem:[#allocation5 + $0x20] sm:$0xff]   ;;  %v1173_v13 = vld [vmem:[#allocation5 + $0x38] sm:$0xff]  }
  0x2b   :  { %v260_v9 = vpack.c.bf16 %v1147_v8, %v1143_v6  ;;  %v1161_v11 = vld [vmem:[#allocation5 + $0x28] sm:$0xff]   ;;  %v1175_v14 = vld [vmem:[#allocation2 + $0x40] sm:$0xff]  ;;  %v1219_v30 = vld [vmem:[#allocation2 + $0x10] sm:$0xff] }
  0x2c   :  { %813 = vmatprep.mubr.bf16.mxu0 %v75_v7  ;;  %v1179_v15 = vld [vmem:[#allocation2 + $0x60] sm:$0xff]  ;;  %v1181_v16 = vld [vmem:[#allocation2 + $0x48] sm:$0xff]  ;;  %v1225_v33 = vld [vmem:[#allocation2 + $0x30] sm:$0xff] }
  0x2d   :  { %800 = vmatpush3.bf16.msra.mxu0 %v1123_v1  ;;  %824 = vmatpush3.bf16.msra.mxu1 %v1123_v1  ;;  %v1183_v17 = vld [vmem:[#allocation2 + $0x68] sm:$0xff]  ;;  %v76_v19 = vpack.c.bf16 %v1179_v15, %v1175_v14  ;;  %v1195_v22 = vld [vmem:[#allocation2 + $0x80] sm:$0xff]  ;;  %v1227_v34 = vld [vmem:[#allocation2 + $0x18] sm:$0xff]  ;;  %v385_v36 = vpack.c.bf16 %v1225_v33, %v1219_v30 }
  0x2e   :  { %801 = vmatprep.subr.bf16.mxu0 %v1131_v2  ;;  %825 = vmatprep.subr.bf16.mxu1 %v1131_v2  ;;  %v1187_v18 = vld [vmem:[#allocation2 + $0x88] sm:$0xff]  ;;  %v261_v20 = vpack.c.bf16 %v1183_v17, %v1181_v16  ;;  %v1197_v23 = vld [vmem:[#allocation2 + $0xa0] sm:$0xff]  ;;  %v1229_v35 = vld [vmem:[#allocation2 + $0x38] sm:$0xff] }
  0x2f   :  { %837 = vmatprep.mubr.bf16.mxu1 %v260_v9  ;;  %v1193_v21 = vld [vmem:[#allocation2 + $0xa8] sm:$0xff]  ;;  %v77_v25 = vpack.c.bf16 %v1197_v23, %v1195_v22  ;;  %v1213_v28 = vld [vmem:[#allocation2 + $0xc0] sm:$0xff]  ;;  %v510_v37 = vpack.c.bf16 %v1229_v35, %v1227_v34  ;;  %v1255_v38 = vld [vmem:[#allocation2 + $0x50] sm:$0xff] }
  0x30   :  { %v262_v24 = vpack.c.bf16 %v1193_v21, %v1187_v18  ;;  %v1207_v26 = vld [vmem:[#allocation2 + $0xc8] sm:$0xff]  ;;  %v1215_v29 = vld [vmem:[#allocation2 + $0xe0] sm:$0xff]  ;;  %v1257_v39 = vld [vmem:[#allocation2 + $0x70] sm:$0xff] }
  0x31   :  { %802 = vmatpush3.bf16.msra.mxu0 %v1131_v2  ;;  %826 = vmatpush3.bf16.msra.mxu1 %v1131_v2  ;;  %v1211_v27 = vld [vmem:[#allocation2 + $0xe8] sm:$0xff]  ;;  %v78_v32 = vpack.c.bf16 %v1215_v29, %v1213_v28  ;;  %v1261_v40 = vld [vmem:[#allocation2 + $0x58] sm:$0xff]  ;;  %v1265_v42 = vld [vmem:[#allocation2 + $0x90] sm:$0xff]  ;;  %v386_v46 = vpack.c.bf16 %v1257_v39, %v1255_v38 }
  0x32   :  { %803 = vmatprep.subr.bf16.mxu0 %v1135_v3  ;;  %827 = vmatprep.subr.bf16.mxu1 %v1135_v3  ;;  %v263_v31 = vpack.c.bf16 %v1211_v27, %v1207_v26  ;;  %v1263_v41 = vld [vmem:[#allocation2 + $0x78] sm:$0xff]  ;;  %v1269_v43 = vld [vmem:[#allocation2 + $0xb0] sm:$0xff]  ;;  %v1300_v56 = vld [vmem:[%s1417_s2] ss:$0 sm:$0xff] }
  0x33   :  { %v1271_v44 = vld [vmem:[#allocation2 + $0x98] sm:$0xff]  ;;  %v511_v47 = vpack.c.bf16 %v1263_v41, %v1261_v40  ;;  %v387_v48 = vpack.c.bf16 %v1269_v43, %v1265_v42  ;;  %v1285_v50 = vld [vmem:[#allocation2 + $0xd0] sm:$0xff] }
  0x34   :  { %v1273_v45 = vld [vmem:[#allocation2 + $0xb8] sm:$0xff]  ;;  %v1287_v51 = vld [vmem:[#allocation2 + $0xf0] sm:$0xff] }
  0x35   :  { %804 = vmatpush3.bf16.msra.mxu0 %v1135_v3  ;;  %828 = vmatpush3.bf16.msra.mxu1 %v1135_v3  ;;  %v512_v49 = vpack.c.bf16 %v1273_v45, %v1271_v44  ;;  %v1289_v52 = vld [vmem:[#allocation2 + $0xd8] sm:$0xff]  ;;  %v388_v54 = vpack.c.bf16 %v1287_v51, %v1285_v50 }
  0x36   :  { %805 = vmatprep.subr.bf16.mxu0 %v1155_v10  ;;  %829 = vmatprep.subr.bf16.mxu1 %v1155_v10  ;;  %v1291_v53 = vld [vmem:[#allocation2 + $0xf8] sm:$0xff] }
  0x37   :  { %v513_v55 = vpack.c.bf16 %v1291_v53, %v1289_v52 }
  0x39   :  { %806 = vmatpush3.bf16.msra.mxu0 %v1155_v10  ;;  %830 = vmatpush3.bf16.msra.mxu1 %v1155_v10 }
  0x3a   :  { %807 = vmatprep.subr.bf16.mxu0 %v1161_v11  ;;  %831 = vmatprep.subr.bf16.mxu1 %v1161_v11 }
  0x3d   :  { %808 = vmatpush3.bf16.msra.mxu0 %v1161_v11  ;;  %832 = vmatpush3.bf16.msra.mxu1 %v1161_v11 }
  0x3e   :  { %809 = vmatprep.subr.bf16.mxu0 %v1167_v12  ;;  %833 = vmatprep.subr.bf16.mxu1 %v1167_v12 }
  0x41   :  { %810 = vmatpush3.bf16.msra.mxu0 %v1167_v12  ;;  %834 = vmatpush3.bf16.msra.mxu1 %v1167_v12 }
  0x42   :  { %811 = vmatprep.subr.bf16.mxu0 %v1173_v13  ;;  %835 = vmatprep.subr.bf16.mxu1 %v1173_v13 }
  0x45   :  { %812 = vmatpush3.bf16.msra.mxu0 %v1173_v13  ;;  %836 = vmatpush3.bf16.msra.mxu1 %v1173_v13 }
  0x46   :  { %845 = vmatprep.subr.bf16.mxu0 %v1121_v0  ;;  %869 = vmatprep.subr.bf16.mxu1 %v1121_v0 }
  0x48   :  { %814 = vmatmul.mubr.bf16.vlgmr.msra.gmra.mrb[0].mxu0 %v76_v19  ;;  %838 = vmatmul.mubr.bf16.vlgmr.msra.gmra.mrb[0].mxu1 %v261_v20 }
  0x49   :  { %846 = vmatpush3.bf16.msra.mxu0 %v1121_v0  ;;  %870 = vmatpush3.bf16.msra.mxu1 %v1121_v0 }
  0x4a   :  { %847 = vmatprep.subr.bf16.mxu0 %v1123_v1  ;;  %871 = vmatprep.subr.bf16.mxu1 %v1123_v1 }
  0x4b   :  { %841 = vmatprep.mubr.bf16.mxu1 %v262_v24  ;;  %817 = vmatprep.mubr.bf16.mxu0 %v77_v25 }
  0x4d   :  { %848 = vmatpush3.bf16.msra.mxu0 %v1123_v1  ;;  %872 = vmatpush3.bf16.msra.mxu1 %v1123_v1 }
  0x4e   :  { %849 = vmatprep.subr.bf16.mxu0 %v1131_v2  ;;  %873 = vmatprep.subr.bf16.mxu1 %v1131_v2 }
  0x50   :  { %842 = vmatmul.mubr.bf16.gmra.mrb[4].mxu1 %v263_v31  ;;  %818 = vmatmul.mubr.bf16.gmra.mrb[4].mxu0 %v78_v32 }
  0x51   :  { %850 = vmatpush3.bf16.msra.mxu0 %v1131_v2  ;;  %874 = vmatpush3.bf16.msra.mxu1 %v1131_v2 }
  0x52   :  { %851 = vmatprep.subr.bf16.mxu0 %v1135_v3  ;;  %875 = vmatprep.subr.bf16.mxu1 %v1135_v3 }
  0x53   :  { %861 = vmatprep.mubr.bf16.mxu0 %v385_v36  ;;  %885 = vmatprep.mubr.bf16.mxu1 %v510_v37  ;;  %v1314_v36 = vld [vmem:[%s1418_s3] ss:$0 sm:$0xff]  ;;  %s1069_s3 = smov [#allocation7]  }
  0x54   :  { %s726_s18 = sshll.u32 %s1069_s3, 4  ;;  %s727_s18 = int_to_ptr.vmem [resolvable:$true] %s726_s18 }
  0x55   :  { %852 = vmatpush3.bf16.msra.mxu0 %v1135_v3  ;;  %876 = vmatpush3.bf16.msra.mxu1 %v1135_v3  ;;  %s1031_s19 = scalar_lea.vmem %s727_s18, 1024  ;;  %p1036_p3 = scmp.lt.s32.totalorder %s727_s18, %s727_s18 }
  0x56   :  { %853 = vmatprep.subr.bf16.mxu0 %v1155_v10  ;;  %877 = vmatprep.subr.bf16.mxu1 %v1155_v10  ;;  %p1032_p2 = scmp.ne.s32.totalorder %s727_s18, %s1031_s19  ;;  %p1037_p4 = scmp.lt.s32.totalorder %s1031_s19, %s1031_s19 }
  0x58   :  { %p1038_p5 = por %p1037_p4, %p1036_p3 }
  0x59   :  { %854 = vmatpush3.bf16.msra.mxu0 %v1155_v10  ;;  %878 = vmatpush3.bf16.msra.mxu1 %v1155_v10 }
  0x5a   :  { %855 = vmatprep.subr.bf16.mxu0 %v1161_v11  ;;  %879 = vmatprep.subr.bf16.mxu1 %v1161_v11  ;;  %p1039_p6 = pnand %p1038_p5, %p1032_p2 }
  0x5d   :  { %856 = vmatpush3.bf16.msra.mxu0 %v1161_v11  ;;  %880 = vmatpush3.bf16.msra.mxu1 %v1161_v11 }
  0x5e   :  { %857 = vmatprep.subr.bf16.mxu0 %v1167_v12  ;;  %881 = vmatprep.subr.bf16.mxu1 %v1167_v12 }
  0x61   :  { %858 = vmatpush3.bf16.msra.mxu0 %v1167_v12  ;;  %882 = vmatpush3.bf16.msra.mxu1 %v1167_v12 }
  0x62   :  { %859 = vmatprep.subr.bf16.mxu0 %v1173_v13  ;;  %883 = vmatprep.subr.bf16.mxu1 %v1173_v13 }
  0x65   :  { %860 = vmatpush3.bf16.msra.mxu0 %v1173_v13  ;;  %884 = vmatpush3.bf16.msra.mxu1 %v1173_v13 }
  0x68   :  { %862 = vmatmul.mubr.bf16.vlgmr.msra.gmra.mrb[8].mxu0 %v386_v46  ;;  %886 = vmatmul.mubr.bf16.vlgmr.msra.gmra.mrb[8].mxu1 %v511_v47 }
  0x69   :  { %865 = vmatprep.mubr.bf16.mxu0 %v387_v48  ;;  %889 = vmatprep.mubr.bf16.mxu1 %v512_v49 }
  0x70   :  { %866 = vmatmul.mubr.bf16.gmra.mrb[12].mxu0 %v388_v54  ;;  %890 = vmatmul.mubr.bf16.gmra.mrb[12].mxu1 %v513_v55 }
 0x11b   :  { %v815_v57 = vpop.f32.mrb[0].mxu0  ;;  %v839_v58 = vpop.f32.mrb[0].mxu1 }
 0x11c   :  { %v176_v59 = vadd.f32 %v815_v57, %v1300_v56  ;;  %v307_v60 = vadd.f32 %v839_v58, %v1300_v56  ;;  %v167_v61 = vpop.f32.mrb[1].mxu0  ;;  %v298_v62 = vpop.f32.mrb[1].mxu1 }
 0x11d   :  { %v168_v63 = vadd.f32 %v1300_v56, %v167_v61  ;;  %v299_v0 = vadd.f32 %v1300_v56, %v298_v62  ;;  %v816_v1 = vpop.f32.mrb[2].mxu0  ;;  %v840_v2 = vpop.f32.mrb[2].mxu1 }
 0x11e   :  { %919 = vtanh.f32 %v176_v59  ;;  %v170_v3 = vpop.f32.mrb[3].mxu0  ;;  %v301_v7 = vpop.f32.mrb[3].mxu1  ;;  %v179_v9 = vadd.f32 %v816_v1, %v1300_v56  ;;  %v310_v10 = vadd.f32 %v840_v2, %v1300_v56 }
 0x11f   :  { %921 = vtanh.f32 %v307_v60  ;;  %v171_v13 = vadd.f32 %v1300_v56, %v170_v3  ;;  %v302_v24 = vadd.f32 %v1300_v56, %v301_v7 }
 0x120   :  { %923 = vtanh.f32 %v168_v63 }
 0x121   :  { %925 = vtanh.f32 %v299_v0 }
 0x122   :  { %927 = vtanh.f32 %v179_v9 }
 0x123   :  { %v843_v11 = vpop.f32.mrb[4].mxu1  ;;  %v819_v12 = vpop.f32.mrb[4].mxu0  ;;  %929 = vtanh.f32 %v310_v10 }
 0x124   :  { %v314_v19 = vpop.f32.mrb[5].mxu1  ;;  %v183_v20 = vpop.f32.mrb[5].mxu0  ;;  %v323_v32 = vadd.f32 %v843_v11, %v1300_v56  ;;  %v192_v47 = vadd.f32 %v819_v12, %v1300_v56  ;;  %931 = vtanh.f32 %v171_v13 }
 0x125   :  { %v844_v25 = vpop.f32.mrb[6].mxu1  ;;  %v820_v31 = vpop.f32.mrb[6].mxu0  ;;  %933 = vtanh.f32 %v302_v24  ;;  %v315_v59 = vadd.f32 %v1300_v56, %v314_v19  ;;  %v184_v60 = vadd.f32 %v1300_v56, %v183_v20 }
 0x126   :  { %v317_v37 = vpop.f32.mrb[7].mxu1  ;;  %v186_v46 = vpop.f32.mrb[7].mxu0  ;;  %935 = vtanh.f32 %v323_v32  ;;  %v326_v1 = vadd.f32 %v844_v25, %v1300_v56  ;;  %v195_v2 = vadd.f32 %v820_v31, %v1300_v56 }
 0x127   :  { %937 = vtanh.f32 %v192_v47  ;;  %v318_v12 = vadd.f32 %v1300_v56, %v317_v37  ;;  %v187_v19 = vadd.f32 %v1300_v56, %v186_v46 }
 0x128   :  { %v920_v48 = vpop.eup %919  ;;  %939 = vtanh.f32 %v315_v59 }
 0x129   :  { %v922_v49 = vpop.eup %921  ;;  %v214_v54 = vmul.f32 %v920_v48, %v1314_v36  ;;  %941 = vtanh.f32 %v184_v60 }
 0x12a   :  { %v924_v55 = vpop.eup %923  ;;  %v339_v57 = vmul.f32 %v922_v49, %v1314_v36  ;;  %943 = vtanh.f32 %v326_v1 }
 0x12b   :  { %v926_v58 = vpop.eup %925  ;;  %224 = vadd.xlane.f32.xlu0 %v214_v54  ;;  %v212_v61 = vmul.f32 %v924_v55, %v1314_v36  ;;  %945 = vtanh.f32 %v195_v2 }
 0x12c   :  { %349 = vadd.xlane.f32.xlu1 %v339_v57  ;;  %v928_v62 = vpop.eup %927  ;;  %v337_v63 = vmul.f32 %v926_v58, %v1314_v36  ;;  %947 = vtanh.f32 %v318_v12 }
 0x12d   :  { %v930_v0 = vpop.eup %929  ;;  %v215_v3 = vmul.f32 %v928_v62, %v1314_v36  ;;  %949 = vtanh.f32 %v187_v19 }
 0x12e   :  { %v932_v7 = vpop.eup %931  ;;  %v340_v9 = vmul.f32 %v930_v0, %v1314_v36 }
 0x12f   :  { %220 = vadd.xlane.f32.xlu0 %v212_v61  ;;  %v934_v10 = vpop.eup %933  ;;  %v213_v20 = vmul.f32 %v932_v7, %v1314_v36 }
 0x130   :  { %345 = vadd.xlane.f32.xlu1 %v337_v63  ;;  %v936_v11 = vpop.eup %935  ;;  %v338_v24 = vmul.f32 %v934_v10, %v1314_v36 }
 0x131   :  { %v938_v13 = vpop.eup %937  ;;  %v343_v25 = vmul.f32 %v936_v11, %v1314_v36 }
 0x132   :  { %v218_v31 = vmul.f32 %v938_v13, %v1314_v36  ;;  %v940_v32 = vpop.eup %939 }
 0x133   :  { %226 = vadd.xlane.f32.xlu0 %v215_v3  ;;  %v942_v47 = vpop.eup %941  ;;  %v341_v60 = vmul.f32 %v940_v32, %v1314_v36 }
 0x134   :  { %351 = vadd.xlane.f32.xlu1 %v340_v9  ;;  %v944_v61 = vpop.eup %943  ;;  %v216_v0 = vmul.f32 %v942_v47, %v1314_v36 }
 0x135   :  { %v946_v1 = vpop.eup %945  ;;  %v344_v7 = vmul.f32 %v944_v61, %v1314_v36 }
 0x136   :  { %v948_v9 = vpop.eup %947  ;;  %v219_v10 = vmul.f32 %v946_v1, %v1314_v36 }
 0x137   :  { %222 = vadd.xlane.f32.xlu0 %v213_v20  ;;  %v950_v11 = vpop.eup %949  ;;  %v342_v32 = vmul.f32 %v948_v9, %v1314_v36 }
 0x138   :  { %347 = vadd.xlane.f32.xlu1 %v338_v24 }
 0x13b   :  { %v887_v37 = vpop.f32.mrb[8].mxu1  ;;  %v863_v48 = vpop.f32.mrb[8].mxu0  ;;  %357 = vadd.xlane.f32.xlu0 %v343_v25 }
 0x13c   :  { %v557_v49 = vadd.f32 %v887_v37, %v1300_v56  ;;  %232 = vadd.xlane.f32.xlu1 %v218_v31  ;;  %v432_v46 = vadd.f32 %v863_v48, %v1300_v56  ;;  %v423_v54 = vpop.f32.mrb[9].mxu0  ;;  %v548_v55 = vpop.f32.mrb[9].mxu1  ;;  %v217_v48 = vmul.f32 %v950_v11, %v1314_v36 }
 0x13d   :  { %v549_v57 = vadd.f32 %v1300_v56, %v548_v55  ;;  %v864_v58 = vpop.f32.mrb[10].mxu0  ;;  %v888_v59 = vpop.f32.mrb[10].mxu1  ;;  %v424_v3 = vadd.f32 %v1300_v56, %v423_v54 }
 0x13e   :  { %v426_v62 = vpop.f32.mrb[11].mxu0  ;;  %v551_v63 = vpop.f32.mrb[11].mxu1  ;;  %951 = vtanh.f32 %v432_v46  ;;  %v435_v2 = vadd.f32 %v864_v58, %v1300_v56  ;;  %v560_v20 = vadd.f32 %v888_v59, %v1300_v56 }
 0x13f   :  { %353 = vadd.xlane.f32.xlu0 %v341_v60  ;;  %953 = vtanh.f32 %v557_v49  ;;  %v427_v12 = vadd.f32 %v1300_v56, %v426_v62  ;;  %v552_v55 = vadd.f32 %v1300_v56, %v551_v63 }
 0x140   :  { %228 = vadd.xlane.f32.xlu1 %v216_v0  ;;  %955 = vtanh.f32 %v549_v57 }
 0x141   :  { %957 = vtanh.f32 %v435_v2 }
 0x142   :  { %959 = vtanh.f32 %v424_v3 }
 0x143   :  { %359 = vadd.xlane.f32.xlu0 %v344_v7  ;;  %v867_v13 = vpop.f32.mrb[12].mxu0  ;;  %v891_v19 = vpop.f32.mrb[12].mxu1  ;;  %961 = vtanh.f32 %v427_v12 }
 0x144   :  { %234 = vadd.xlane.f32.xlu1 %v219_v10  ;;  %v439_v24 = vpop.f32.mrb[13].mxu0  ;;  %v564_v25 = vpop.f32.mrb[13].mxu1  ;;  %v448_v31 = vadd.f32 %v867_v13, %v1300_v56  ;;  %963 = vtanh.f32 %v560_v20 }
 0x145   :  { %v868_v47 = vpop.f32.mrb[14].mxu0  ;;  %v892_v37 = vpop.f32.mrb[14].mxu1  ;;  %v440_v58 = vadd.f32 %v1300_v56, %v439_v24  ;;  %v565_v61 = vadd.f32 %v1300_v56, %v564_v25  ;;  %v573_v24 = vadd.f32 %v891_v19, %v1300_v56 }
 0x146   :  { %v442_v49 = vpop.f32.mrb[15].mxu0  ;;  %v567_v46 = vpop.f32.mrb[15].mxu1  ;;  %965 = vtanh.f32 %v448_v31  ;;  %v451_v13 = vadd.f32 %v868_v47, %v1300_v56 }
 0x147   :  { %355 = vadd.xlane.f32.xlu0 %v342_v32  ;;  %967 = vtanh.f32 %v552_v55  ;;  %v443_v63 = vadd.f32 %v1300_v56, %v442_v49  ;;  %v568_v9 = vadd.f32 %v1300_v56, %v567_v46 }
 0x148   :  { %230 = vadd.xlane.f32.xlu1 %v217_v48  ;;  %v952_v54 = vpop.eup %951  ;;  %969 = vtanh.f32 %v440_v58  ;;  %v576_v48 = vadd.f32 %v892_v37, %v1300_v56 }
 0x149   :  { %v954_v57 = vpop.eup %953  ;;  %v464_v59 = vmul.f32 %v952_v54, %v1314_v36  ;;  %971 = vtanh.f32 %v565_v61 }
 0x14a   :  { %v956_v60 = vpop.eup %955  ;;  %v589_v1 = vmul.f32 %v954_v57, %v1314_v36  ;;  %973 = vtanh.f32 %v443_v63 }
 0x14b   :  { %474 = vadd.xlane.f32.xlu0 %v464_v59  ;;  %v587_v62 = vmul.f32 %v956_v60, %v1314_v36  ;;  %v958_v0 = vpop.eup %957  ;;  %975 = vtanh.f32 %v568_v9 }
 0x14c   :  { %v960_v2 = vpop.eup %959  ;;  %v465_v3 = vmul.f32 %v958_v0, %v1314_v36  ;;  %977 = vtanh.f32 %v451_v13 }
 0x14d   :  { %595 = vadd.xlane.f32.xlu1 %v587_v62  ;;  %v962_v7 = vpop.eup %961  ;;  %v462_v11 = vmul.f32 %v960_v2, %v1314_v36  ;;  %979 = vtanh.f32 %v573_v24 }
 0x14e   :  { %v964_v10 = vpop.eup %963  ;;  %v463_v20 = vmul.f32 %v962_v7, %v1314_v36  ;;  %981 = vtanh.f32 %v576_v48 }
 0x14f   :  { %599 = vadd.xlane.f32.xlu0 %v589_v1  ;;  %v590_v25 = vmul.f32 %v964_v10, %v1314_v36 }
 0x150   :  { %v966_v12 = vpop.eup %965 }
 0x151   :  { %476 = vadd.xlane.f32.xlu1 %v465_v3  ;;  %v468_v31 = vmul.f32 %v966_v12, %v1314_v36  ;;  %v968_v32 = vpop.eup %967 }
 0x152   :  { %v970_v49 = vpop.eup %969  ;;  %v588_v47 = vmul.f32 %v968_v32, %v1314_v36 }
 0x153   :  { %470 = vadd.xlane.f32.xlu0 %v462_v11  ;;  %v972_v46 = vpop.eup %971  ;;  %v466_v19 = vmul.f32 %v970_v49, %v1314_v36 }
 0x154   :  { %v591_v54 = vmul.f32 %v972_v46, %v1314_v36  ;;  %v974_v55 = vpop.eup %973 }
 0x155   :  { %472 = vadd.xlane.f32.xlu1 %v463_v20  ;;  %v976_v57 = vpop.eup %975  ;;  %v467_v58 = vmul.f32 %v974_v55, %v1314_v36 }
 0x156   :  { %v978_v56 = vpop.eup %977  ;;  %v592_v37 = vmul.f32 %v976_v57, %v1314_v36 }
 0x157   :  { %601 = vadd.xlane.f32.xlu0 %v590_v25  ;;  %v980_v59 = vpop.eup %979  ;;  %v469_v60 = vmul.f32 %v978_v56, %v1314_v36 }
 0x158   :  { %v982_v61 = vpop.eup %981  ;;  %v593_v62 = vmul.f32 %v980_v59, %v1314_v36 }
 0x159   :  { %482 = vadd.xlane.f32.xlu1 %v468_v31  ;;  %v594_v0 = vmul.f32 %v982_v61, %v1314_v36 }
 0x15b   :  { %597 = vadd.xlane.f32.xlu0 %v588_v47 }
 0x15d   :  { %478 = vadd.xlane.f32.xlu1 %v466_v19 }
 0x15f   :  { %603 = vadd.xlane.f32.xlu0 %v591_v54 }
 0x161   :  { %480 = vadd.xlane.f32.xlu1 %v467_v58 }
 0x163   :  { %605 = vadd.xlane.f32.xlu0 %v592_v37 }
 0x165   :  { %484 = vadd.xlane.f32.xlu1 %v469_v60 }
 0x167   :  { %607 = vadd.xlane.f32.xlu0 %v593_v62 }
 0x169   :  { %609 = vadd.xlane.f32.xlu1 %v594_v0 }
 0x1b8   :  { %v225_v1 = vpop.xlane.xlu0 %224 }
 0x1b9   :  { %v350_v2 = vpop.xlane.xlu1 %349 }
 0x1bc   :  { %v221_v63 = vpop.xlane.xlu0 %220 }
 0x1bd   :  { %v346_v3 = vpop.xlane.xlu1 %345 }
 0x1c0   :  { %v227_v7 = vpop.xlane.xlu0 %226 }
 0x1c1   :  { %v352_v9 = vpop.xlane.xlu1 %351 }
 0x1c4   :  { %v223_v10 = vpop.xlane.xlu0 %222 }
 0x1c5   :  { %v348_v11 = vpop.xlane.xlu1 %347  ;;  %v236_v31 = vadd.f32 %v223_v10, %v221_v63 }
 0x1c6   :  { %v361_v25 = vadd.f32 %v348_v11, %v346_v3 }
 0x1c7   :  { %v237_v46 = vadd.f32 %v236_v31, %v225_v1 }
 0x1c8   :  { %v358_v12 = vpop.xlane.xlu0 %357  ;;  %v362_v49 = vadd.f32 %v361_v25, %v350_v2 }
 0x1c9   :  { %v233_v13 = vpop.xlane.xlu1 %232  ;;  %v238_v19 = vadd.f32 %v237_v46, %v227_v7 }
 0x1ca   :  { %v363_v54 = vadd.f32 %v362_v49, %v352_v9 }
 0x1cc   :  { %v354_v20 = vpop.xlane.xlu0 %353 }
 0x1cd   :  { %v229_v24 = vpop.xlane.xlu1 %228  ;;  %v364_v58 = vadd.f32 %v363_v54, %v354_v20 }
 0x1ce   :  { %v239_v57 = vadd.f32 %v238_v19, %v229_v24 }
 0x1d0   :  { %v360_v32 = vpop.xlane.xlu0 %359 }
 0x1d1   :  { %v235_v48 = vpop.xlane.xlu1 %234 }
 0x1d4   :  { %v356_v36 = vpop.xlane.xlu0 %355 }
 0x1d5   :  { %v231_v47 = vpop.xlane.xlu1 %230  ;;  %v365_v59 = vadd.f32 %v364_v58, %v356_v36 }
 0x1d6   :  { %v240_v37 = vadd.f32 %v239_v57, %v231_v47 }
 0x1d7   :  { %v366_v0 = vadd.f32 %v365_v59, %v358_v12 }
 0x1d8   :  { %v475_v55 = vpop.xlane.xlu0 %474  ;;  %v241_v62 = vadd.f32 %v240_v37, %v233_v13 }
 0x1d9   :  { %v367_v11 = vadd.f32 %v366_v0, %v360_v32 }
 0x1da   :  { %v596_v56 = vpop.xlane.xlu1 %595  ;;  %v242_v10 = vadd.f32 %v241_v62, %v235_v48 }
 0x1db   :  { %v368_v7 = vrot.slane %v367_v11, 4 }
 0x1dc   :  { %v600_v60 = vpop.xlane.xlu0 %599  ;;  %v243_v31 = vrot.slane %v242_v10, 4 }
 0x1dd   :  { %v369_v47 = vadd.f32 %v368_v7, %v367_v11 }
 0x1de   :  { %v477_v61 = vpop.xlane.xlu1 %476  ;;  %v244_v46 = vadd.f32 %v243_v31, %v242_v10  ;;  %v65_v10 = vlaneseq }
 0x1df   :  { %v370_v48 = vrot.slane %v369_v47, 2 }
 0x1e0   :  { %v471_v3 = vpop.xlane.xlu0 %470  ;;  %v245_v58 = vrot.slane %v244_v46, 2 }
 0x1e2   :  { %v473_v63 = vpop.xlane.xlu1 %472 }
 0x1e3   :  { %v486_v2 = vadd.f32 %v473_v63, %v471_v3  ;;  %v246_v3 = vadd.f32 %v245_v58, %v244_v46 }
 0x1e4   :  { %v602_v1 = vpop.xlane.xlu0 %601 }
 0x1e5   :  { %v487_v9 = vadd.f32 %v486_v2, %v475_v55  ;;  %v371_v55 = vadd.f32 %v370_v48, %v369_v47  ;;  %v247_v31 = vrot.slane %v246_v3, 1 }
 0x1e6   :  { %v483_v25 = vpop.xlane.xlu1 %482 }
 0x1e7   :  { %v488_v19 = vadd.f32 %v487_v9, %v477_v61  ;;  %v372_v7 = vrot.slane %v371_v55, 1 }
 0x1e8   :  { %v598_v49 = vpop.xlane.xlu0 %597 }
 0x1e9   :  { %v611_v24 = vadd.f32 %v598_v49, %v596_v56  ;;  %v66_v49 = vand.u32 127, %v65_v10 }
 0x1ea   :  { %v479_v20 = vpop.xlane.xlu1 %478 }
 0x1eb   :  { %v612_v36 = vadd.f32 %v611_v24, %v600_v60  ;;  %v489_v13 = vadd.f32 %v488_v19, %v479_v20  ;;  %vm249_vm0 = vcmp.eq.s32.totalorder %v66_v49, 0  ;;  %vm374_vm1 = vcmp.eq.s32.totalorder %v66_v49, 1 }
 0x1ec   :  { %v604_v54 = vpop.xlane.xlu0 %603  ;;  %vm499_vm2 = vcmp.eq.s32.totalorder %v66_v49, 2  ;;  %vm624_vm3 = vcmp.eq.s32.totalorder %v66_v49, 3  ;;  %v1067_v49 = vmov 2  }
 0x1ed   :  { %v613_v12 = vadd.f32 %v612_v36, %v602_v1 }
 0x1ee   :  { %v481_v57 = vpop.xlane.xlu1 %480 }
 0x1ef   :  { %v614_v32 = vadd.f32 %v613_v12, %v604_v54  ;;  %v490_v37 = vadd.f32 %v489_v13, %v481_v57  ;;  %v373_v54 = vadd.f32 %v372_v7, %v371_v55 }
 0x1f0   :  { %v606_v59 = vpop.xlane.xlu0 %605 }
 0x1f1   :  { %v491_v62 = vadd.f32 %v490_v37, %v483_v25  ;;  %v615_v63 = vadd.f32 %v614_v32, %v606_v59  ;;  %v248_v25 = vadd.f32 %v247_v31, %v246_v3  ;;  %v375_v58 = vsel %vm374_vm1, %v373_v54, 0.0 }
 0x1f2   :  { %v485_v0 = vpop.xlane.xlu1 %484  ;;  %v1066_v31 = vmov 0  }
 0x1f3   :  { %v492_v56 = vadd.f32 %v491_v62, %v485_v0  ;;  %v250_v57 = vsel %vm249_vm0, %v248_v25, 0.0  ;;  %906 = vset.pattern.permute.xlu0 %v1066_v31 }
 0x1f4   :  { %v608_v2 = vpop.xlane.xlu0 %607  ;;  %v376_v37 = vadd.f32 %v375_v58, %v250_v57 }
 0x1f5   :  { %v493_v11 = vrot.slane %v492_v56, 4  ;;  %v616_v60 = vadd.f32 %v615_v63, %v608_v2 }
 0x1f6   :  { %v610_v61 = vpop.xlane.xlu1 %609 }
 0x1f7   :  { %v494_v1 = vadd.f32 %v493_v11, %v492_v56  ;;  %v617_v9 = vadd.f32 %v616_v60, %v610_v61  ;;  %v1065_v61 = vmov 1  }
 0x1f8   :  { %907 = vset.pattern.permute.xlu1 %v1065_v61 }
 0x1f9   :  { %v495_v24 = vrot.slane %v494_v1, 2  ;;  %v618_v20 = vrot.slane %v617_v9, 4 }
 0x1fb   :  { %v496_v36 = vadd.f32 %v495_v24, %v494_v1  ;;  %v619_v19 = vadd.f32 %v618_v20, %v617_v9  ;;  %v1068_v24 = vmov 3  }
 0x1fd   :  { %v497_v46 = vrot.slane %v496_v36, 1  ;;  %v620_v47 = vrot.slane %v619_v19, 2 }
 0x1ff   :  { %v498_v13 = vadd.f32 %v497_v46, %v496_v36  ;;  %v621_v12 = vadd.f32 %v620_v47, %v619_v19 }
 0x201   :  { %v622_v48 = vrot.slane %v621_v12, 1  ;;  %v500_v32 = vsel %vm499_vm2, %v498_v13, 0.0 }
 0x202   :  { %v501_v62 = vadd.f32 %v500_v32, %v376_v37 }
 0x203   :  { %v623_v59 = vadd.f32 %v622_v48, %v621_v12 }
 0x205   :  { %v625_v0 = vsel %vm624_vm3, %v623_v59, 0.0 }
 0x206   :  { %v626_v63 = vadd.f32 %v625_v0, %v501_v62 }
 0x208   :  { %v627_v3 = vmul.f32 0.015625, %v626_v63 }
 0x20a   :  { %v629_v55 = vsel %vm628_vm4, %v627_v3, -inf }
 0x20b   :  { %630 = vmax.xlane.f32.xlu0 %v629_v55 }
 0x298   :  { %v631_v56 = vpop.xlane.xlu0 %630 }
 0x299   :  { %v632_v2 = vsub.f32 %v627_v3, %v631_v56 }
 0x29b   :  { %v633_v10 = vmul.f32 1.442695, %v632_v2 }
 0x29d   :  { %983 = vpow2.f32 %v633_v10 }
 0x2a7   :  { %v984_v11 = vpop.eup %983 }
 0x2a8   :  { %v635_v60 = vsel %vm628_vm4, %v984_v11, 0.0 }
 0x2a9   :  { %636 = vadd.xlane.f32.xlu1 %v635_v60 }
 0x336   :  { %v637_v7 = vpop.xlane.xlu1 %636 }
 0x337   :  { %985 = vrcp.f32 %v637_v7 }
 0x341   :  { %v986_v1 = vpop.eup %985 }
 0x342   :  { %v639_v9 = vmul.f32 %v986_v1, %v984_v11 }
 0x344   :  { %654 = vperm.xlu1 %907, %v639_v9   ;;  %642 = vperm.xlu0 %906, %v639_v9  }
 0x348   :  { %908 = vset.pattern.permute.xlu1 %v1067_v49  ;;  %910 = vset.pattern.permute.xlu0 %v1068_v24 }
 0x349   :  { %674 = vperm.xlu1 %908, %v639_v9  }
 0x34d   :  { %909 = vset.pattern.permute.xlu1 %v1068_v24 }
 0x34e   :  { %694 = vperm.xlu1 %909, %v639_v9  }
 0x3c3   :  { %v655_v20 = vpop.permute.xlu1 %654  ;;  %v643_v36 = vpop.permute.xlu0 %642 }
 0x3c4   :  { %v657_v19 = vmul.f32 %v655_v20, %v1143_v6  ;;  %v658_v25 = vmul.f32 %v655_v20, %v1147_v8  ;;  %v659_v54 = vmul.f32 %v655_v20, %v1181_v16  ;;  %v660_v46 = vmul.f32 %v655_v20, %v1183_v17 }
 0x3c5   :  { %v661_v47 = vmul.f32 %v655_v20, %v1187_v18  ;;  %v662_v13 = vmul.f32 %v655_v20, %v1193_v21  ;;  %v663_v12 = vmul.f32 %v655_v20, %v1207_v26  ;;  %v664_v57 = vmul.f32 %v655_v20, %v1211_v27 }
 0x3c6   :  { %v645_v58 = vmul.f32 %v643_v36, %v1139_v4  ;;  %v646_v48 = vmul.f32 %v643_v36, %v1141_v5  ;;  %v647_v6 = vmul.f32 %v643_v36, %v1175_v14  ;;  %v648_v8 = vmul.f32 %v643_v36, %v1179_v15 }
 0x3c7   :  { %v649_v16 = vmul.f32 %v643_v36, %v1195_v22  ;;  %v650_v17 = vmul.f32 %v643_v36, %v1197_v23  ;;  %v651_v18 = vmul.f32 %v643_v36, %v1213_v28  ;;  %v652_v21 = vmul.f32 %v643_v36, %v1215_v29 }
 0x3c8   :  { %v665_v32 = vadd.f32 %v657_v19, %v645_v58  ;;  %v666_v26 = vadd.f32 %v658_v25, %v646_v48  ;;  %v667_v37 = vadd.f32 %v659_v54, %v647_v6  ;;  %v668_v27 = vadd.f32 %v660_v46, %v648_v8  ;;  %v675_v59 = vpop.permute.xlu1 %674 }
 0x3c9   :  { %v669_v4 = vadd.f32 %v661_v47, %v649_v16  ;;  %v670_v62 = vadd.f32 %v662_v13, %v650_v17  ;;  %v671_v5 = vadd.f32 %v663_v12, %v651_v18  ;;  %v672_v0 = vadd.f32 %v664_v57, %v652_v21 }
 0x3ca   :  { %v677_v14 = vmul.f32 %v675_v59, %v1219_v30  ;;  %v678_v15 = vmul.f32 %v675_v59, %v1225_v33  ;;  %v679_v22 = vmul.f32 %v675_v59, %v1255_v38  ;;  %v680_v23 = vmul.f32 %v675_v59, %v1257_v39 }
 0x3cb   :  { %v681_v28 = vmul.f32 %v675_v59, %v1265_v42  ;;  %v682_v29 = vmul.f32 %v675_v59, %v1269_v43  ;;  %v683_v63 = vmul.f32 %v675_v59, %v1285_v50  ;;  %v684_v3 = vmul.f32 %v675_v59, %v1287_v51 }
 0x3cc   :  { %v685_v55 = vadd.f32 %v677_v14, %v665_v32  ;;  %v686_v56 = vadd.f32 %v678_v15, %v666_v26  ;;  %v687_v2 = vadd.f32 %v679_v22, %v667_v37  ;;  %v688_v10 = vadd.f32 %v680_v23, %v668_v27 }
 0x3cd   :  { %v695_v11 = vpop.permute.xlu1 %694  ;;  %v689_v30 = vadd.f32 %v681_v28, %v669_v4  ;;  %v690_v60 = vadd.f32 %v682_v29, %v670_v62  ;;  %v691_v33 = vadd.f32 %v683_v63, %v671_v5  ;;  %v692_v61 = vadd.f32 %v684_v3, %v672_v0 }
 0x3ce   :  { %v697_v38 = vmul.f32 %v695_v11, %v1227_v34  ;;  %v698_v39 = vmul.f32 %v695_v11, %v1229_v35  ;;  %v699_v42 = vmul.f32 %v695_v11, %v1261_v40  ;;  %v700_v43 = vmul.f32 %v695_v11, %v1263_v41 }
 0x3cf   :  { %v701_v50 = vmul.f32 %v695_v11, %v1271_v44  ;;  %v702_v51 = vmul.f32 %v695_v11, %v1273_v45  ;;  %v703_v31 = vmul.f32 %v695_v11, %v1289_v52  ;;  %v704_v7 = vmul.f32 %v695_v11, %v1291_v53 }
 0x3d0   :  { %v705_v1 = vadd.f32 %v697_v38, %v685_v55  ;;  %v706_v9 = vadd.f32 %v698_v39, %v686_v56  ;;  %v707_v49 = vadd.f32 %v699_v42, %v687_v2  ;;  %v708_v34 = vadd.f32 %v700_v43, %v688_v10 }
 0x3d1   :  { %v709_v24 = vadd.f32 %v701_v50, %v689_v30  ;;  %v710_v35 = vadd.f32 %v702_v51, %v690_v60  ;;  %v711_v20 = vadd.f32 %v703_v31, %v691_v33  ;;  %v712_v40 = vadd.f32 %v704_v7, %v692_v61 }
 0x3d2   :  { %713 = vst [vmem:[#allocation7] sm:$0xff] %v705_v1  ;;  %714 = vst [vmem:[#allocation7 + $0x8] sm:$0xff] %v706_v9 }
 0x3d3   :  { %715 = vst [vmem:[#allocation7 + $0x10] sm:$0xff] %v707_v49  ;;  %716 = vst [vmem:[#allocation7 + $0x18] sm:$0xff] %v708_v34 }
 0x3d4   :  { %717 = vst [vmem:[#allocation7 + $0x20] sm:$0xff] %v709_v24  ;;  %718 = vst [vmem:[#allocation7 + $0x28] sm:$0xff] %v710_v35 }
 0x3d5   :  { %719 = vst [vmem:[#allocation7 + $0x30] sm:$0xff] %v711_v20  ;;  %720 = vst [vmem:[#allocation7 + $0x38] sm:$0xff] %v712_v40 }
 0x3d6   :  { %1042 = shalt.err (!%p1039_p6)
}
 0x3d7   :  { %s1043_s22 = scalar_lea.hbm %s1419_s4, 1024 }
 0x3d8   :  { %p1044_p7 = scmp.ne.s32.totalorder %s1419_s4, %s1043_s22  ;;  %p1047_p8 = scmp.lt.u32.totalorder %s1043_s22, %s1419_s4 }
 0x3da   :  { %p1049_p9 = pnand %p1047_p8, %p1044_p7 }
 0x3dc   :  { %1052 = shalt.err (!%p1049_p9)
}
 0x3dd   :  { %s1070_s27 = smov 128   ;;  %s1071_s28 = smov 8  }
 0x3de   :  { %732 = dma.vmem_to_hbm [thread:$0]  %s727_s18, 1024, %s1419_s4, [#allocation4], %s1070_s27, %s1070_s27, %s1071_s28  }
 0x3df   :  { %1057 = dma.done.wait [#allocation4], 1024  }
 0x3e0   :  { %1058 = vsyncadd [#allocation4], 4294966272 }
 0x3e1   :  { %736 = vsyncpa [#allocation3], 1 }
 0x3e2   :  { %737 = vsyncpa [#allocation6], 1 }
 0x3e3   :  { %738 = vsyncpa [#allocation4], 1 }

</bundles_post_ra>
